<compile_context>
chip_gen: v6e
topology: v6e:2x2x1
jax: 0.10.0
libtpu: 0.0.40
codegen_flags: <defaults>
</compile_context>

<pallas_src>
import functools

import jax
import jax.numpy as jnp
from jax.experimental import pallas as pl
from jax.experimental.pallas import tpu as pltpu


def _round_up(a: int, b: int) -> int:
    return -(-a // b) * b


def _label_smoothing_kernel(x_ref, t_ref, out_ref, *, smoothing: float,
                            total_rows: int):
    i = pl.program_id(0)

    x = x_ref[...].astype(jnp.float32)            # (TB, C)
    tb, c = x.shape

    off = jnp.float32(smoothing / (c - 1.0))
    on = jnp.float32(1.0 - smoothing)

    # logsumexp along the class (lane) axis.
    m = jnp.max(x, axis=-1, keepdims=True)                                # (TB, 1)
    lse = m + jnp.log(jnp.sum(jnp.exp(x - m), axis=-1, keepdims=True))    # (TB, 1)

    # Single fused weighted reduce: sum_j w_j * x_j, with w_j = off everywhere
    # except the target column (= 1 - smoothing).  Since sum_j w_j == 1,
    #   row_loss = -sum_j w_j * (x_j - lse) = lse - sum_j w_j * x_j.
    col = jax.lax.broadcasted_iota(jnp.int32, (tb, c), 1)
    tgt = t_ref[...]                                                      # (TB, 1)
    w = jnp.where(col == tgt, on, off)                                    # (TB, C)
    wsum = jnp.sum(x * w, axis=-1, keepdims=True)                         # (TB, 1)

    row_loss = lse - wsum                                                 # (TB, 1)

    # Mask rows of the (possibly partial) last block; garbage/NaN in over-read
    # rows is confined to its own row and discarded by the select.
    rows = i * tb + jax.lax.broadcasted_iota(jnp.int32, (tb, 1), 0)
    row_loss = jnp.where(rows < total_rows, row_loss, jnp.float32(0.0))

    # One scalar partial sum per tile, written lane-dense into a (1, 8, 128)
    # block at position [0, 0, 0] (zeros elsewhere) -> full-vreg store.
    partial = jnp.sum(row_loss)
    sub = jax.lax.broadcasted_iota(jnp.int32, (1, 8, 128), 1)
    lane = jax.lax.broadcasted_iota(jnp.int32, (1, 8, 128), 2)
    out_ref[...] = jnp.where((sub == 0) & (lane == 0), partial,
                             jnp.float32(0.0))


def label_smoothing_loss(logits, target, smoothing=0.1, tile_rows=None):
    """logits: (N, C) float (f32 or bf16); target: (N,) int. Returns scalar f32."""
    n, c = logits.shape
    in_isz = jnp.dtype(logits.dtype).itemsize
    row_align = 8 if in_isz >= 4 else 32          # sub-32-bit dtypes pack sublanes

    # Generation-aware VMEM budgets (64 MiB/TC on v7x, 128 MiB on v5e/v6e).
    try:
        vmem_capacity = int(pltpu.get_tpu_info().vmem_capacity_bytes)
    except Exception:
        vmem_capacity = 64 * 1024 * 1024          # conservative fallback (v7x)
    vmem_limit = max(16 * 1024 * 1024, (vmem_capacity * 3) // 4)   # 48 / 96 MiB
    budget = max(8 * 1024 * 1024, (vmem_capacity * 45) // 100)     # block budget

    if tile_rows is None:
        # Per-row VMEM cost estimate: double-buffered logits tile + ~5 f32
        # (TB, C) temporaries (iota / weight / exp / product / diff), +1 more
        # for the bf16->f32 up-cast, + ~4 KiB of lane-padded (TB, 1) columns.
        temp_per_elem = 20 + (4 if in_isz < 4 else 0)
        per_row = c * (2 * in_isz + temp_per_elem) + 4096
        max_rows_vmem = budget // per_row
        # Target up to ~4 MiB of raw logits per block to amortize the ~0.35 us
        # fixed per-grid-step overhead (no hard row cap).
        max_rows_block = (4 * 1024 * 1024) // (c * in_isz)
        max_rows = (min(max_rows_vmem, max_rows_block) // row_align) * row_align
        max_rows = max(row_align, max_rows)
        tile_rows = min(max_rows, _round_up(n, row_align))
    assert tile_rows % row_align == 0, "tile_rows must respect sublane alignment"

    num_tiles = -(-n // tile_rows)

    target2d = target.astype(jnp.int32).reshape(n, 1)

    kernel = functools.partial(_label_smoothing_kernel,
                               smoothing=float(smoothing), total_rows=n)

    cost = pl.CostEstimate(
        flops=6 * n * c,
        transcendentals=n * c + n,
        bytes_accessed=n * c * in_isz + n * 4 + num_tiles * 8 * 128 * 4,
    )

    partials = pl.pallas_call(
        kernel,
        out_shape=jax.ShapeDtypeStruct((num_tiles, 8, 128), jnp.float32),
        grid_spec=pltpu.PrefetchScalarGridSpec(
            num_scalar_prefetch=0,
            grid=(num_tiles,),
            in_specs=[
                pl.BlockSpec((tile_rows, c), lambda i: (i, 0)),
                pl.BlockSpec((tile_rows, 1), lambda i: (i, 0)),
            ],
            out_specs=pl.BlockSpec((1, 8, 128), lambda i: (i, 0, 0)),
        ),
        compiler_params=pltpu.CompilerParams(
            dimension_semantics=("parallel",),   # independent tiles -> megacore
            vmem_limit_bytes=int(vmem_limit),
        ),
        cost_estimate=cost,
    )(logits, target2d)

    return jnp.sum(partials) / jnp.float32(n)


def _reference(logits, target, smoothing=0.1):
    n, c = logits.shape
    log_prob = jax.nn.log_softmax(logits.astype(jnp.float32), axis=-1)
    off = smoothing / (c - 1.0)
    weight = jnp.full((n, c), off, dtype=jnp.float32)
    weight = weight.at[jnp.arange(n), target].set(1.0 - smoothing)
    return jnp.mean(jnp.sum(-weight * log_prob, axis=-1))


if __name__ == "__main__":
    key = jax.random.PRNGKey(0)
    k1, k2, k3, k4 = jax.random.split(key, 4)

    # Case 1: f32, tile divides evenly.
    N, C = 16, 128
    logits = jax.random.normal(k1, (N, C), dtype=jnp.float32)
    target = jax.random.randint(k2, (N,), 0, C, dtype=jnp.int32)
    loss = jax.block_until_ready(label_smoothing_loss(logits, target, 0.1))
    ref = _reference(logits, target, 0.1)
    assert jnp.allclose(loss, ref, rtol=1e-4, atol=1e-4), (loss, ref)

    # Case 2: bf16, N not a multiple of the tile -> exercises the partial last
    # block, in-kernel row masking, f32 up-cast and multi-tile partial sums.
    N2, C2 = 50, 256
    logits2 = jax.random.normal(k3, (N2, C2), dtype=jnp.float32).astype(jnp.bfloat16)
    target2 = jax.random.randint(k4, (N2,), 0, C2, dtype=jnp.int32)
    loss2 = jax.block_until_ready(
        label_smoothing_loss(logits2, target2, 0.1, tile_rows=32))
    ref2 = _reference(logits2, target2, 0.1)
    assert jnp.allclose(loss2, ref2, rtol=5e-3, atol=5e-3), (loss2, ref2)

    print("KERNEL_OK")
</pallas_src>

<mosaic_0001>
module attributes {stable_mosaic.version = 11 : i64} {
  func.func @_label_smoothing_kernel(%arg0: i32, %arg1: memref<16x128xf32, #tpu.memory_space<vmem>>, %arg2: memref<16x1xi32, #tpu.memory_space<vmem>>, %arg3: memref<1x8x128xf32, #tpu.memory_space<vmem>>) attributes {dimension_semantics = [#tpu.dimension_semantics<parallel>], iteration_bounds = array<i64: 1>, scalar_prefetch = 0 : i64, scratch_operands = 0 : i64, tpu.core_type = #tpu.core_type<tc>, window_params = [{transform_indices = @transform_0, window_bounds = array<i64: 16, 128>}, {transform_indices = @transform_1, window_bounds = array<i64: 16, 1>}, {transform_indices = @transform_2, window_bounds = array<i64: 1, 8, 128>}]} {
    %c0 = arith.constant 0 : index
    %c0_0 = arith.constant 0 : index
    %0 = vector.load %arg1[%c0, %c0_0] : memref<16x128xf32, #tpu.memory_space<vmem>>, vector<16x128xf32>
    %cst = arith.constant dense<0xFF800000> : vector<16xf32>
    %1 = vector.multi_reduction <maximumf>, %0, %cst [1] : vector<16x128xf32> to vector<16xf32>
    %2 = vector.shape_cast %1 : vector<16xf32> to vector<16x1xf32>
    %3 = vector.broadcast %2 : vector<16x1xf32> to vector<16x128xf32>
    %4 = arith.subf %0, %3 : vector<16x128xf32>
    %5 = math.exp %4 : vector<16x128xf32>
    %cst_1 = arith.constant dense<0.000000e+00> : vector<16xf32>
    %6 = vector.multi_reduction <add>, %5, %cst_1 [1] : vector<16x128xf32> to vector<16xf32>
    %7 = vector.shape_cast %6 : vector<16xf32> to vector<16x1xf32>
    %8 = math.log %7 : vector<16x1xf32>
    %9 = arith.addf %2, %8 : vector<16x1xf32>
    %10 = tpu.iota {dimensions = array<i32: 1>} : vector<16x128xi32>
    %c0_2 = arith.constant 0 : index
    %c0_3 = arith.constant 0 : index
    %11 = vector.load %arg2[%c0_2, %c0_3] : memref<16x1xi32, #tpu.memory_space<vmem>>, vector<16x1xi32>
    %12 = vector.broadcast %11 : vector<16x1xi32> to vector<16x128xi32>
    %13 = arith.cmpi eq, %10, %12 : vector<16x128xi32>
    %cst_4 = arith.constant 0.899999976 : f32
    %cst_5 = arith.constant 7.87401571E-4 : f32
    %14 = vector.broadcast %cst_4 : f32 to vector<16x128xf32>
    %15 = vector.broadcast %cst_5 : f32 to vector<16x128xf32>
    %16 = arith.select %13, %14, %15 : vector<16x128xi1>, vector<16x128xf32>
    %17 = arith.mulf %0, %16 : vector<16x128xf32>
    %cst_6 = arith.constant dense<0.000000e+00> : vector<16xf32>
    %18 = vector.multi_reduction <add>, %17, %cst_6 [1] : vector<16x128xf32> to vector<16xf32>
    %19 = vector.shape_cast %18 : vector<16xf32> to vector<16x1xf32>
    %20 = arith.subf %9, %19 : vector<16x1xf32>
    %c16_i32 = arith.constant 16 : i32
    %21 = arith.muli %arg0, %c16_i32 : i32
    %22 = tpu.iota {dimensions = array<i32: 0>} : vector<16x1xi32>
    %23 = vector.broadcast %21 : i32 to vector<16x1xi32>
    %24 = arith.addi %23, %22 : vector<16x1xi32>
    %c16_i32_7 = arith.constant 16 : i32
    %25 = vector.broadcast %c16_i32_7 : i32 to vector<16x1xi32>
    %26 = arith.cmpi slt, %24, %25 : vector<16x1xi32>
    %cst_8 = arith.constant 0.000000e+00 : f32
    %27 = vector.broadcast %cst_8 : f32 to vector<16x1xf32>
    %28 = arith.select %26, %20, %27 : vector<16x1xi1>, vector<16x1xf32>
    %29 = vector.shape_cast %28 : vector<16x1xf32> to vector<1x16x1xf32>
    %cst_9 = arith.constant dense<0.000000e+00> : vector<1xf32>
    %30 = vector.multi_reduction <add>, %29, %cst_9 [1, 2] : vector<1x16x1xf32> to vector<1xf32>
    %31 = vector.shape_cast %30 : vector<1xf32> to vector<1x1x1xf32>
    %32 = vector.extract %31[0, 0, 0] : f32 from vector<1x1x1xf32>
    %33 = tpu.iota {dimensions = array<i32: 1>} : vector<1x8x128xi32>
    %34 = tpu.iota {dimensions = array<i32: 2>} : vector<1x8x128xi32>
    %c0_i32 = arith.constant 0 : i32
    %35 = vector.broadcast %c0_i32 : i32 to vector<1x8x128xi32>
    %36 = arith.cmpi eq, %33, %35 : vector<1x8x128xi32>
    %c0_i32_10 = arith.constant 0 : i32
    %37 = vector.broadcast %c0_i32_10 : i32 to vector<1x8x128xi32>
    %38 = arith.cmpi eq, %34, %37 : vector<1x8x128xi32>
    %39 = arith.andi %36, %38 : vector<1x8x128xi1>
    %cst_11 = arith.constant 0.000000e+00 : f32
    %40 = vector.broadcast %32 : f32 to vector<1x8x128xf32>
    %41 = vector.broadcast %cst_11 : f32 to vector<1x8x128xf32>
    %42 = arith.select %39, %40, %41 : vector<1x8x128xi1>, vector<1x8x128xf32>
    %c0_12 = arith.constant 0 : index
    %c0_13 = arith.constant 0 : index
    %c0_14 = arith.constant 0 : index
    %43 = vector.load %arg3[%c0_12, %c0_13, %c0_14] : memref<1x8x128xf32, #tpu.memory_space<vmem>>, vector<1x8x128xf32>
    tpu.vector_store %arg3[%c0_12, %c0_13, %c0_14], %42 {strides = array<i32>} : memref<1x8x128xf32, #tpu.memory_space<vmem>>, vector<1x8x128xf32>,
    return
  }
  func.func @transform_0(%arg0: i32) -> (i32, i32) {
    %c0_i32 = arith.constant 0 : i32
    %c0_i32_0 = arith.constant 0 : i32
    return %arg0, %c0_i32 : i32, i32
  }
  func.func @transform_1(%arg0: i32) -> (i32, i32) {
    %c0_i32 = arith.constant 0 : i32
    %c0_i32_0 = arith.constant 0 : i32
    return %arg0, %c0_i32 : i32, i32
  }
  func.func @transform_2(%arg0: i32) -> (i32, i32, i32) {
    %c0_i32 = arith.constant 0 : i32
    %c0_i32_0 = arith.constant 0 : i32
    %c0_i32_1 = arith.constant 0 : i32
    return %arg0, %c0_i32, %c0_i32_0 : i32, i32, i32
  }
}

</mosaic_0001>

<bundles_post_ra>
// kernel: tpu_custom_call.1
= control target key start
LH: loop header
LB: loop body
LE: loop exit
PB: predicated region body
PF: predicated region fallthrough
CT: control target
= control target key end

     0   :  { %v137_v2 = vmov 0   ;;  %s170_s0 = inlined_call_operand.vmem [shape: f32[16,128], index: 0, kind: input, shape index: {}]   ;;  %s171_s1 = inlined_call_operand.vmem [shape: s32[16,1], index: 1, kind: input, shape index: {}]   ;;  %s172_s2 = inlined_call_operand.hbm [shape: f32[1,8,128], index: 2, kind: output, shape index: {}]  }
   0x1   :  { %v12_v0 = vld [vmem:[%s170_s0] sm:$0xff]  ;;  %105 = vset.pattern.permute.xlu1 %v137_v2 }
   0x2   :  { %v36_v1 = vld [vmem:[%s171_s1] sm:$0xff]  ;;  %14 = vmax.xlane.f32.xlu0 %v12_v0 }
   0x3   :  { %7 = vsyncpa [#allocation3], 0  ;;  %v13_v3 = vld [vmem:[%s170_s0 + $0x8] sm:$0xff]  ;;  %39 = vperm.xlu1 %105, %v36_v1   ;;  %106 = vset.pattern.permute.xlu0 %v137_v2  ;;  %v34_v10 = vlaneseq  ;;  %v138_v15 = vmov 0.0007874016   ;;  %vm67_vm2 = vcmask 7168  }
   0x4   :  { %v37_v4 = vld [vmem:[%s171_s1 + $0x8] sm:$0xff]  ;;  %s139_s0 = smov [#allocation2]  }
   0x5   :  { %v35_v13 = vand.u32 127, %v34_v10  ;;  %v58_v44 = vshrl.u32 %v34_v10, 7  ;;  %s92_s1 = sshll.u32 %s139_s0, 4  ;;  %s93_s1 = int_to_ptr.vmem [resolvable:$true] %s92_s1 }
   0x6   :  { %16 = vmax.xlane.f32.xlu0 %v13_v3  ;;  %s115_s18 = scalar_lea.vmem %s93_s1, 128  ;;  %p120_p1 = scmp.lt.s32.totalorder %s93_s1, %s93_s1 }
   0x7   :  { %42 = vperm.xlu1 %105, %v37_v4   ;;  %vm80_vm3 = vcmp.eq.s32.totalorder %v58_v44, 0  ;;  %vm81_vm4 = vcmp.eq.s32.totalorder %v35_v13, 0  ;;  %p116_p0 = scmp.ne.s32.totalorder %s93_s1, %s115_s18  ;;  %p121_p2 = scmp.lt.s32.totalorder %s115_s18, %s115_s18 }
   0x8   :  { %vm82_vm5 = vmand %vm80_vm3, %vm81_vm4 }
   0x9   :  { %p122_p3 = por %p121_p2, %p120_p1 }
   0xb   :  { %p123_p4 = pnand %p122_p3, %p116_p0 }
  0x7e   :  { %v40_v12 = vpop.permute.xlu1 %39 }
  0x7f   :  { %vm44_vm0 = vcmp.eq.s32.totalorder %v35_v13, %v40_v12 }
  0x80   :  { %v46_v16 = vsel %vm44_vm0, 0.9, %v138_v15 }
  0x81   :  { %v48_v18 = vmul.f32 %v46_v16, %v12_v0 }
  0x82   :  { %v43_v14 = vpop.permute.xlu1 %42 }
  0x83   :  { %vm45_vm1 = vcmp.eq.s32.totalorder %v35_v13, %v43_v14 }
  0x84   :  { %v47_v19 = vsel %vm45_vm1, 0.9, %v138_v15 }
  0x85   :  { %v49_v21 = vmul.f32 %v47_v19, %v13_v3 }
  0x8b   :  { %v15_v5 = vpop.xlane.xlu0 %14 }
  0x8c   :  { %v18_v6 = vsub.f32 %v12_v0, %v15_v5 }
  0x8e   :  { %v20_v7 = vmul.f32 1.442695, %v18_v6 }
  0x8f   :  { %v17_v8 = vpop.xlane.xlu0 %16 }
  0x90   :  { %107 = vpow2.f32 %v20_v7  ;;  %v19_v9 = vsub.f32 %v13_v3, %v17_v8 }
  0x92   :  { %v22_v11 = vmul.f32 1.442695, %v19_v9 }
  0x94   :  { %109 = vpow2.f32 %v22_v11 }
  0x9d   :  { %v108_v17 = vpop.eup %107 }
  0x9e   :  { %24 = vadd.xlane.f32.xlu0 %v108_v17 }
  0xa1   :  { %v110_v20 = vpop.eup %109 }
  0xa2   :  { %26 = vadd.xlane.f32.xlu1 %v110_v20  ;;  %50 = vadd.xlane.f32.xlu0 %v48_v18 }
  0xa6   :  { %52 = vadd.xlane.f32.xlu0 %v49_v21 }
 0x127   :  { %v25_v22 = vpop.xlane.xlu0 %24 }
 0x128   :  { %111 = vlog2.f32 %v25_v22 }
 0x12b   :  { %v27_v23 = vpop.xlane.xlu1 %26  ;;  %v51_v26 = vpop.xlane.xlu0 %50 }
 0x12c   :  { %113 = vlog2.f32 %v27_v23 }
 0x12f   :  { %v53_v32 = vpop.xlane.xlu0 %52 }
 0x135   :  { %v112_v24 = vpop.eup %111 }
 0x136   :  { %v29_v25 = vmul.f32 0.6931472, %v112_v24 }
 0x138   :  { %v32_v27 = vadd.f32 %v29_v25, %v15_v5 }
 0x139   :  { %v114_v28 = vpop.eup %113 }
 0x13a   :  { %v31_v29 = vmul.f32 0.6931472, %v114_v28  ;;  %v54_v30 = vsub.f32 %v32_v27, %v51_v26 }
 0x13c   :  { %v33_v31 = vadd.f32 %v31_v29, %v17_v8  ;;  %v68_v34 = vsel %vm67_vm2, %v54_v30, 0.0 }
 0x13e   :  { %v55_v33 = vsub.f32 %v33_v31, %v53_v32 }
 0x140   :  { %v69_v35 = vsel %vm67_vm2, %v55_v33, 0.0 }
 0x141   :  { %v70_v36 = vadd.f32 %v69_v35, %v68_v34 }
 0x143   :  { %71 = vadd.xlane.f32.xlu0 %v70_v36 }
 0x1cc   :  { %v72_v37 = vpop.xlane.xlu0 %71 }
 0x1cd   :  { %v73_v38 = vrot.slane %v72_v37, 4 }
 0x1cf   :  { %v74_v39 = vadd.f32 %v73_v38, %v72_v37 }
 0x1d1   :  { %v75_v40 = vrot.slane %v74_v39, 2 }
 0x1d3   :  { %v76_v41 = vadd.f32 %v75_v40, %v74_v39 }
 0x1d5   :  { %v77_v42 = vrot.slane %v76_v41, 1 }
 0x1d7   :  { %v78_v43 = vadd.f32 %v77_v42, %v76_v41 }
 0x1d9   :  { %100 = vpush %v78_v43 }
 0x20a   :  { %s101_s17 = spop %100 }
 0x20b   :  { %v83_v45 = vstv %s101_s17 }
 0x20c   :  { %v84_v46 = vsel %vm82_vm5, %v83_v45, 0.0 }
 0x20d   :  { %85 = vst [vmem:[#allocation2] sm:$0xff] %v84_v46 }
 0x20e   :  { %126 = shalt.err (!%p123_p4)
}
 0x20f   :  { %95 = dma.vmem_to_hbm [thread:$0]  %s93_s1, 128, %s172_s2, [#allocation3]  }
 0x210   :  { %135 = dma.done.wait [#allocation3], 128  }
 0x211   :  { %136 = vsyncadd [#allocation3], 4294967168 }
 0x212   :  { %99 = vsyncpa [#allocation3], 1 }

</bundles_post_ra>
